<compile_context>
chip_gen: v7x
topology: tpu7x:2x2x1
jax: 0.10.0
libtpu: 0.0.40
codegen_flags: <defaults>
</compile_context>

<pallas_src>
import functools

import jax
import jax.numpy as jnp
from jax.experimental import pallas as pl
from jax.experimental.pallas import tpu as pltpu


def _make_divisible(v, divisor, min_value=None):
    if min_value is None:
        min_value = divisor
    new_v = max(min_value, int(v + divisor / 2) // divisor * divisor)
    if new_v < 0.9 * v:
        new_v += divisor
    return new_v


def _chip_vmem_bytes():
    """Physical VMEM per TensorCore; conservative fallback if unavailable."""
    try:
        return int(pltpu.get_tpu_info().vmem_capacity_bytes)
    except Exception:
        return 64 * 2**20  # v7x per-TC size (the smallest of v5e/v6e/v7x)


def _se_kernel(x_ref, w1t_ref, b1_ref, w2t_ref, b2_ref, o_ref, *, inv_hw):
    # x_ref / o_ref: (NB, C, HW) in the input dtype.
    # w1t_ref: (C, Cs); b1_ref: (1, Cs); w2t_ref: (Cs, C); b2_ref: (1, C)  (f32)

    # adaptive_avg_pool2d(input, 1): f32-accumulating mean over spatial.
    # (No full-slab f32 upcast — the convert is streamed into the reduction.)
    pooled = jnp.sum(x_ref[...], axis=2, dtype=jnp.float32) * inv_hw   # (NB, C)

    # fc1 (1x1 conv) + ReLU: (NB, C) @ (C, Cs) -> (NB, Cs)
    h = jnp.dot(pooled, w1t_ref[...], preferred_element_type=jnp.float32)
    h = jnp.maximum(h + b1_ref[...], 0.0)

    # fc2 (1x1 conv): (NB, Cs) @ (Cs, C) -> (NB, C)
    s = jnp.dot(h, w2t_ref[...], preferred_element_type=jnp.float32)
    s = s + b2_ref[...]

    # hardsigmoid: relu6(x + 3) / 6
    scale = jnp.clip((s + 3.0) * (1.0 / 6.0), 0.0, 1.0)                # (NB, C)

    # scale * input, broadcast over HW, multiply done in the input dtype so no
    # f32 copy of the slab is ever materialized (fine at 3e-2 bf16 tolerance).
    o_ref[...] = x_ref[...] * scale[:, :, None].astype(o_ref.dtype)


def _pick_batch_block(n, slab_bytes, weight_bytes, budget_bytes,
                      target_step_bytes=2 << 20):
    """Smallest divisor of n whose per-step in+out traffic reaches
    ~target_step_bytes (amortizes the ~0.35us/step overhead), subject to the
    double-buffered footprint fitting the VMEM budget.  Bigger blocks past the
    HBM-roofline knee buy no bandwidth but cost VMEM, pipeline-overlap steps
    and cross-TensorCore sharding granularity."""
    divisors = [d for d in range(1, n + 1) if n % d == 0]
    fitting = [d for d in divisors
               if 4 * d * slab_bytes + weight_bytes <= budget_bytes]
    if not fitting:
        fitting = [1]
    nb = fitting[-1]                       # fallback: biggest block that fits
    for d in fitting:                      # smallest block hitting the target
        if 2 * d * slab_bytes >= target_step_bytes:
            nb = d
            break
    # Keep >= 2 grid steps when possible (pipeline overlap; batch-axis
    # sharding granularity on multi-TensorCore chips).
    if n >= 2 and n // nb < 2:
        for d in reversed(fitting):
            if n // d >= 2:
                nb = d
                break
    return nb


def squeeze_excitation(x, w1, b1, w2, b2, *, vmem_budget_bytes=None):
    """x: (N, C, H, W); w1: (Cs, C); b1: (Cs,); w2: (C, Cs); b2: (C,)."""
    N, C, H, W = x.shape
    HW = H * W
    Cs = w1.shape[0]
    itemsize = jnp.dtype(x.dtype).itemsize

    # Natural NC(HW) layout everywhere: reshape is free (no HBM pass).  Masked
    # <128-lane stores on small-HW stages are far cheaper than the two extra
    # full HBM passes a wrapper-level (C,HW)<->(HW,C) transpose would cost.
    x_flat = x.reshape(N, C, HW)

    # Row-major f32 weights for the batched mat-vecs (resident in VMEM).
    w1t = jnp.asarray(w1, jnp.float32).T                    # (C, Cs)
    w2t = jnp.asarray(w2, jnp.float32).T                    # (Cs, C)
    b1r = jnp.asarray(b1, jnp.float32).reshape(1, Cs)
    b2r = jnp.asarray(b2, jnp.float32).reshape(1, C)

    slab_bytes = C * HW * itemsize
    weight_bytes = (w1t.size + w2t.size + b1r.size + b2r.size) * 4

    # Chip-aware VMEM sizing: budget ~37.5% of physical for the pipelined
    # footprint, scoped limit capped at ~50% (headroom for Mosaic scratch).
    chip_vmem = _chip_vmem_bytes()
    budget = (int(vmem_budget_bytes) if vmem_budget_bytes is not None
              else int(0.375 * chip_vmem))

    nb = _pick_batch_block(N, slab_bytes, weight_bytes, budget)
    grid = (N // nb,)

    pipelined_bytes = 4 * nb * slab_bytes + weight_bytes     # 2x (in+out) + W
    vmem_limit = int(min(0.5 * chip_vmem,
                         max(8 * 2**20, pipelined_bytes * 1.3 + (2 << 20))))
    # TODO(synk): for single-image slabs whose footprint exceeds the budget,
    # add an inner HW-chunk pipeline (pltpu.emit_pipeline + pooled-sum scratch).

    cost = pl.CostEstimate(
        flops=N * (2 * C * HW + 4 * C * Cs),
        transcendentals=0,
        bytes_accessed=2 * N * C * HW * itemsize + weight_bytes,
    )

    kernel = functools.partial(_se_kernel, inv_hw=1.0 / HW)

    # TODO(synk): on v7x, switch the batch axis to pltpu.CORE_PARALLEL (or an
    # explicit pl.core_map / create_tensorcore_mesh split) to engage both
    # TensorCores; plain "parallel" is kept here for v5e/v6e portability.
    out_flat = pl.pallas_call(
        kernel,
        out_shape=jax.ShapeDtypeStruct((N, C, HW), x.dtype),
        grid_spec=pltpu.PrefetchScalarGridSpec(
            num_scalar_prefetch=0,
            grid=grid,
            in_specs=[
                pl.BlockSpec((nb, C, HW), lambda b: (b, 0, 0)),
                # Constant block index -> weights stay resident (no re-DMA).
                pl.BlockSpec((C, Cs), lambda b: (0, 0)),
                pl.BlockSpec((1, Cs), lambda b: (0, 0)),
                pl.BlockSpec((Cs, C), lambda b: (0, 0)),
                pl.BlockSpec((1, C), lambda b: (0, 0)),
            ],
            out_specs=pl.BlockSpec((nb, C, HW), lambda b: (b, 0, 0)),
        ),
        compiler_params=pltpu.CompilerParams(
            dimension_semantics=("parallel",),
            vmem_limit_bytes=vmem_limit),
        cost_estimate=cost,
    )(x_flat, w1t, b1r, w2t, b2r)

    return out_flat.reshape(N, C, H, W)


def _reference(x, w1, b1, w2, b2):
    pooled = jnp.mean(x, axis=(2, 3), keepdims=True)                 # (N,C,1,1)
    h = jnp.einsum("nchw,oc->nohw", pooled, w1) + b1[None, :, None, None]
    h = jnp.maximum(h, 0.0)
    s = jnp.einsum("nchw,oc->nohw", h, w2) + b2[None, :, None, None]
    scale = jnp.clip((s + 3.0) / 6.0, 0.0, 1.0)
    return scale * x


if __name__ == "__main__":
    key = jax.random.PRNGKey(0)

    def make_params(k, C, squeeze_factor=4):
        Cs = _make_divisible(C // squeeze_factor, 8)
        k_w1, k_b1, k_w2, k_b2 = jax.random.split(k, 4)
        w1 = 0.1 * jax.random.normal(k_w1, (Cs, C), dtype=jnp.float32)
        b1 = 0.1 * jax.random.normal(k_b1, (Cs,), dtype=jnp.float32)
        w2 = 0.1 * jax.random.normal(k_w2, (C, Cs), dtype=jnp.float32)
        b2 = 0.1 * jax.random.normal(k_b2, (C,), dtype=jnp.float32)
        return w1, b1, w2, b2

    k_x1, k_p1, k_x2, k_p2 = jax.random.split(key, 4)

    # Config 1: early-stage shape (HW = 256 >= 128).
    x1 = jax.random.normal(k_x1, (2, 4, 16, 16), dtype=jnp.float32)
    p1 = make_params(k_p1, 4)
    out1 = jax.block_until_ready(squeeze_excitation(x1, *p1))
    ref1 = _reference(x1, *p1)
    assert out1.shape == x1.shape
    assert jnp.allclose(out1, ref1, atol=1e-5, rtol=1e-5), "mismatch (early)"

    # Config 2: late-stage shape (HW = 49 < 128 < C) — masked lane stores,
    # but no wrapper transpose passes.
    x2 = jax.random.normal(k_x2, (4, 160, 7, 7), dtype=jnp.float32)
    p2 = make_params(k_p2, 160)
    out2 = jax.block_until_ready(squeeze_excitation(x2, *p2))
    ref2 = _reference(x2, *p2)
    assert out2.shape == x2.shape
    assert jnp.allclose(out2, ref2, atol=1e-5, rtol=1e-5), "mismatch (late)"

    # Config 3: bf16 storage (f32 pooled/FC math, bf16 scale multiply + store).
    x1_bf = x1.astype(jnp.bfloat16)
    out_bf = jax.block_until_ready(squeeze_excitation(x1_bf, *p1))
    ref_bf = _reference(x1_bf.astype(jnp.float32), *p1)
    assert out_bf.dtype == jnp.bfloat16
    assert jnp.allclose(out_bf.astype(jnp.float32), ref_bf,
                        atol=3e-2, rtol=3e-2), "mismatch (bf16 path)"

    print("KERNEL_OK")
</pallas_src>

<mosaic_0001>
module attributes {stable_mosaic.version = 11 : i64} {
  func.func @_se_kernel(%arg0: i32, %arg1: memref<1x4x256xf32, #tpu.memory_space<vmem>>, %arg2: memref<4x8xf32, #tpu.memory_space<vmem>>, %arg3: memref<1x8xf32, #tpu.memory_space<vmem>>, %arg4: memref<8x4xf32, #tpu.memory_space<vmem>>, %arg5: memref<1x4xf32, #tpu.memory_space<vmem>>, %arg6: memref<1x4x256xf32, #tpu.memory_space<vmem>>) attributes {dimension_semantics = [#tpu.dimension_semantics<parallel>], iteration_bounds = array<i64: 2>, scalar_prefetch = 0 : i64, scratch_operands = 0 : i64, tpu.core_type = #tpu.core_type<tc>, window_params = [{transform_indices = @transform_0, window_bounds = array<i64: 1, 4, 256>}, {pipeline_mode = #tpu.pipeline_mode<synchronous>, transform_indices = @transform_1, window_bounds = array<i64: 4, 8>}, {pipeline_mode = #tpu.pipeline_mode<synchronous>, transform_indices = @transform_2, window_bounds = array<i64: 1, 8>}, {pipeline_mode = #tpu.pipeline_mode<synchronous>, transform_indices = @transform_3, window_bounds = array<i64: 8, 4>}, {pipeline_mode = #tpu.pipeline_mode<synchronous>, transform_indices = @transform_4, window_bounds = array<i64: 1, 4>}, {transform_indices = @transform_5, window_bounds = array<i64: 1, 4, 256>}]} {
    %c0 = arith.constant 0 : index
    %c0_0 = arith.constant 0 : index
    %c0_1 = arith.constant 0 : index
    %0 = vector.load %arg1[%c0, %c0_0, %c0_1] : memref<1x4x256xf32, #tpu.memory_space<vmem>>, vector<1x4x256xf32>
    %cst = arith.constant dense<0.000000e+00> : vector<1x4xf32>
    %1 = vector.multi_reduction <add>, %0, %cst [2] : vector<1x4x256xf32> to vector<1x4xf32>
    %cst_2 = arith.constant 3.906250e-03 : f32
    %2 = vector.broadcast %cst_2 : f32 to vector<1x4xf32>
    %3 = arith.mulf %1, %2 : vector<1x4xf32>
    %c0_3 = arith.constant 0 : index
    %c0_4 = arith.constant 0 : index
    %4 = vector.load %arg2[%c0_3, %c0_4] : memref<4x8xf32, #tpu.memory_space<vmem>>, vector<4x8xf32>
    %cst_5 = arith.constant dense<0.000000e+00> : vector<1x8xf32>
    %5 = tpu.matmul %3, %4, %cst_5 {dimension_numbers = #tpu.dot_dimension_numbers<[1], [0], [0], [1], [0, 0, 1, 1], [], []>} : vector<1x4xf32>, vector<4x8xf32>, vector<1x8xf32> -> vector<1x8xf32>
    %c0_6 = arith.constant 0 : index
    %c0_7 = arith.constant 0 : index
    %6 = vector.load %arg3[%c0_6, %c0_7] : memref<1x8xf32, #tpu.memory_space<vmem>>, vector<1x8xf32>
    %7 = arith.addf %5, %6 : vector<1x8xf32>
    %cst_8 = arith.constant 0.000000e+00 : f32
    %8 = vector.broadcast %cst_8 : f32 to vector<1x8xf32>
    %9 = arith.maximumf %7, %8 : vector<1x8xf32>
    %c0_9 = arith.constant 0 : index
    %c0_10 = arith.constant 0 : index
    %10 = vector.load %arg4[%c0_9, %c0_10] : memref<8x4xf32, #tpu.memory_space<vmem>>, vector<8x4xf32>
    %cst_11 = arith.constant dense<0.000000e+00> : vector<1x4xf32>
    %11 = tpu.matmul %9, %10, %cst_11 {dimension_numbers = #tpu.dot_dimension_numbers<[1], [0], [0], [1], [0, 0, 1, 1], [], []>} : vector<1x8xf32>, vector<8x4xf32>, vector<1x4xf32> -> vector<1x4xf32>
    %c0_12 = arith.constant 0 : index
    %c0_13 = arith.constant 0 : index
    %12 = vector.load %arg5[%c0_12, %c0_13] : memref<1x4xf32, #tpu.memory_space<vmem>>, vector<1x4xf32>
    %13 = arith.addf %11, %12 : vector<1x4xf32>
    %cst_14 = arith.constant 3.000000e+00 : f32
    %14 = vector.broadcast %cst_14 : f32 to vector<1x4xf32>
    %15 = arith.addf %13, %14 : vector<1x4xf32>
    %cst_15 = arith.constant 0.166666672 : f32
    %16 = vector.broadcast %cst_15 : f32 to vector<1x4xf32>
    %17 = arith.mulf %15, %16 : vector<1x4xf32>
    %cst_16 = arith.constant 0.000000e+00 : f32
    %cst_17 = arith.constant 1.000000e+00 : f32
    %18 = vector.broadcast %cst_16 : f32 to vector<1x4xf32>
    %19 = arith.maximumf %18, %17 : vector<1x4xf32>
    %20 = vector.broadcast %cst_17 : f32 to vector<1x4xf32>
    %21 = arith.minimumf %20, %19 : vector<1x4xf32>
    %c0_18 = arith.constant 0 : index
    %c0_19 = arith.constant 0 : index
    %c0_20 = arith.constant 0 : index
    %22 = vector.load %arg1[%c0_18, %c0_19, %c0_20] : memref<1x4x256xf32, #tpu.memory_space<vmem>>, vector<1x4x256xf32>
    %23 = vector.shape_cast %21 : vector<1x4xf32> to vector<1x4x1xf32>
    %24 = vector.broadcast %23 : vector<1x4x1xf32> to vector<1x4x256xf32>
    %25 = arith.mulf %22, %24 : vector<1x4x256xf32>
    %c0_21 = arith.constant 0 : index
    %c0_22 = arith.constant 0 : index
    %c0_23 = arith.constant 0 : index
    %26 = vector.load %arg6[%c0_21, %c0_22, %c0_23] : memref<1x4x256xf32, #tpu.memory_space<vmem>>, vector<1x4x256xf32>
    tpu.vector_store %arg6[%c0_21, %c0_22, %c0_23], %25 {strides = array<i32>} : memref<1x4x256xf32, #tpu.memory_space<vmem>>, vector<1x4x256xf32>,
    return
  }
  func.func @transform_0(%arg0: i32) -> (i32, i32, i32) {
    %c0_i32 = arith.constant 0 : i32
    %c0_i32_0 = arith.constant 0 : i32
    %c0_i32_1 = arith.constant 0 : i32
    return %arg0, %c0_i32, %c0_i32_0 : i32, i32, i32
  }
  func.func @transform_1(%arg0: i32) -> (i32, i32) {
    %c0_i32 = arith.constant 0 : i32
    %c0_i32_0 = arith.constant 0 : i32
    %c0_i32_1 = arith.constant 0 : i32
    return %c0_i32, %c0_i32_0 : i32, i32
  }
  func.func @transform_2(%arg0: i32) -> (i32, i32) {
    %c0_i32 = arith.constant 0 : i32
    %c0_i32_0 = arith.constant 0 : i32
    %c0_i32_1 = arith.constant 0 : i32
    return %c0_i32, %c0_i32_0 : i32, i32
  }
  func.func @transform_3(%arg0: i32) -> (i32, i32) {
    %c0_i32 = arith.constant 0 : i32
    %c0_i32_0 = arith.constant 0 : i32
    %c0_i32_1 = arith.constant 0 : i32
    return %c0_i32, %c0_i32_0 : i32, i32
  }
  func.func @transform_4(%arg0: i32) -> (i32, i32) {
    %c0_i32 = arith.constant 0 : i32
    %c0_i32_0 = arith.constant 0 : i32
    %c0_i32_1 = arith.constant 0 : i32
    return %c0_i32, %c0_i32_0 : i32, i32
  }
  func.func @transform_5(%arg0: i32) -> (i32, i32, i32) {
    %c0_i32 = arith.constant 0 : i32
    %c0_i32_0 = arith.constant 0 : i32
    %c0_i32_1 = arith.constant 0 : i32
    return %arg0, %c0_i32, %c0_i32_0 : i32, i32, i32
  }
}

</mosaic_0001>

<bundles_post_ra>
// kernel: tpu_custom_call.1
= control target key start
LH: loop header
LB: loop body
LE: loop exit
PB: predicated region body
PF: predicated region fallthrough
CT: control target
= control target key end

     0   :  { %10 = vsyncpa [#allocation3], 0  ;;  %s914_s0 = inlined_call_operand.hbm [shape: f32[2,4,256], index: 0, kind: input, shape index: {}]   ;;  %s915_s1 = inlined_call_operand.vmem [shape: f32[4,8], index: 1, kind: input, shape index: {}]   ;;  %s916_s2 = inlined_call_operand.vmem [shape: f32[1,8], index: 2, kind: input, shape index: {}]   ;;  %s917_s3 = inlined_call_operand.vmem [shape: f32[8,4], index: 3, kind: input, shape index: {}]   ;;  %s918_s4 = inlined_call_operand.vmem [shape: f32[1,4], index: 4, kind: input, shape index: {}]   ;;  %s919_s5 = inlined_call_operand.hbm [shape: f32[2,4,256], index: 5, kind: output, shape index: {}]  }
   0x1   :  { %12 = vsyncpa [#allocation3 + $0x1], 0 }
   0x2   :  { %13 = vsyncpa [#allocation4], 0 }
   0x3   :  { %15 = vsyncpa [#allocation4 + $0x1], 0  ;;  %s737_s18 = smov 0   ;;  %s739_s19 = smov 0  }
   0x4   :  { %s741_s20 = smov 0   ;;  %s743_s21 = smov 0  }
   0x5 LB: > { %s758_s22 = sadd.s32 4294967295, %s700_s21   ;;  %s521_s23 = sadd.s32 4294967294, %s700_s21   ;;  %s700_s21 = sphi %s743_s21, %s934_s21   ;;  %s696_s20 = sphi %s741_s20, %s933_s20   ;;  %s692_s19 = sphi %s739_s19, %s932_s19   ;;  %s688_s18 = sphi %s737_s18, %s931_s18  }
   0x6   : > { %s762_s24 = sadd.s32 1, %s700_s21   ;;  %s28_s25 = sadd.s32 1, %s696_s20 }
   0x7   : > { %s25_s26 = ssub.s32 %s700_s21, %s762_s24  ;;  %p35_p0 = scmp.ne.s32.totalorder %s696_s20, %s692_s19 }
   0x8   : > { %p26_p1 = scmp.eq.s32.totalorder %s25_s26, 0  ;;  %p36_p2 = scmp.eq.s32.totalorder %s700_s21, 0 }
   0x9   : > { %p41_p3 = scmp.ne.s32.totalorder %s692_s19, %s688_s18  ;;  %p42_p4 = scmp.eq.s32.totalorder %s758_s22, 0 }
   0xa   : > { %s774_s27 = scalar_select %p26_p1, %s696_s20, %s28_s25  }
   0xb   : > { %p776_p5 = por %p36_p2, %p35_p0  ;;  %p780_p6 = por %p42_p4, %p41_p3 }
   0xc   : > { %p149_p7 = scmp.eq.s32.totalorder %s758_s22, 1  ;;  %p155_p8 = scmp.eq.s32.totalorder %s521_s23, 1 }
   0xd   : > { %p566_p10 = scmp.lt.s32.totalorder %s700_s21, 2  ;;  %s187_s7 = sand.u32 1, %s696_s20  }
   0xe   : > { %p787_p11 = por %p149_p7, %p35_p0  ;;  %p791_p12 = por %p155_p8, %p41_p3 }
   0xf   : > { %s538_s8 = sshll.u32 %s700_s21, 7  ;;  %s524_s9 = sshll.u32 %s187_s7, 3 }
  0x10   : > { %s923_s30 = scalar_select %p787_p11, 1, 0 }
  0x11   : > { %s924_s6 = scalar_select %p791_p12, 1, 0 }
  0x12   : > { %s800_s12 = scalar_lea.hbm %s914_s0, %s538_s8  ;;  %s191_s13 = scalar_lea.vmem [#allocation2], %s524_s9 }
  0x13   : > { %s199_s14 = sshll.u32 %s191_s13, 4  ;;  %p804_p13 = pnand %p566_p10, %p776_p5  ;;  %s808_s14 = int_to_ptr.vmem [resolvable:$true] %s199_s14 }
  0x14   : > { %s188_s16 = scalar_lea.sflag [#allocation3], %s187_s7  ;;  %s604_s17 = scalar_lea.hbm %s800_s12, 128 }
  0x15   : > { %p605_p2 = scmp.ne.s32.totalorder %s800_s12, %s604_s17  ;;  %p606_p3 = pneg %p804_p13 }
  0x16   : > { %s609_s26 = scalar_lea.hbm %s914_s0, 256  ;;  %p610_p5 = scmp.lt.u32.totalorder %s800_s12, %s914_s0 }
  0x17   : > { %p607_p4 = pnand %p606_p3, %p605_p2  ;;  %p611_p8 = scmp.lt.u32.totalorder %s609_s26, %s604_s17 }
  0x18   : > { %p613_p9 = scmp.lt.u32.totalorder %s604_s17, %s800_s12 }
  0x19   : > { %p608_p7 = pneg %p607_p4  ;;  %p612_p10 = por %p611_p8, %p610_p5 }
  0x1b   : > { %p614_p0 = por %p613_p9, %p612_p10 }
  0x1d   : > { %p615_p1 = pnand %p614_p0, %p608_p7 }
  0x1f   : > { %618 = shalt.err (!%p615_p1)
}
  0x20   : > { %s619_s7 = scalar_lea.vmem %s808_s14, 128  ;;  %s702_s9 = smov [#allocation2]  }
  0x21   : > { %p620_p2 = scmp.ne.s32.totalorder %s808_s14, %s619_s7  ;;  %s624_s10 = sshll.u32 %s702_s9, 4  ;;  %s625_s10 = int_to_ptr.vmem [resolvable:$false] %s624_s10 }
  0x22   : > { %s626_s11 = scalar_lea.vmem %s625_s10, 256  ;;  %p627_p11 = scmp.lt.s32.totalorder %s808_s14, %s625_s10 }
  0x23   : > { %p622_p4 = pnand %p620_p2, %p606_p3  ;;  %p628_p5 = scmp.lt.s32.totalorder %s626_s11, %s619_s7 }
  0x25   : > { %p623_p12 = pneg %p622_p4  ;;  %p629_p8 = por %p628_p5, %p627_p11 }
  0x27   : > { %p630_p9 = pnand %p629_p8, %p623_p12 }
  0x29   : > { %633 = shalt.err (!%p630_p9)
}
  0x2a   : > { %561 = dma.hbm_to_vmem [thread:$0]  (!%p804_p13), %s800_s12, 128, %s808_s14, %s188_s16  }
  0x2b   : > { %p926_p0 = scmp.lt.s32.totalorder %s700_s21, 3  ;;  %p927_p1 = scmp.ge.s32.totalorder %s700_s21, 1 }
  0x2d   : > { %p205_p3 = pnand %p927_p1, %p926_p0 }
  0x2e   : > { %s842_s13 = sand.u32 (!%p205_p3), 1, %s692_s19  }
  0x2f   : > { %208 = sbr.rel (%p205_p3) target bundleno = 780 (0x30c), region = 40  ;;  %s528_s17 = sshll.u32 (!%p205_p3), %s842_s13, 3 }
  0x30   : > { %s211_s23 = scalar_lea.sflag (!%p205_p3), [#allocation3], %s842_s13  ;;  %s214_s15 = scalar_lea.vmem (!%p205_p3), [#allocation2], %s528_s17 }
  0x36   : > { %679 = dma.done.wait (%p780_p6), %s211_s23, 128  }
  0x37   : > { %681 = vsyncadd (%p780_p6), %s211_s23, 4294967168  ;;  %vm245_vm0 = vcmask 1043456   ;;  %v241_v0 = vld [vmem:[%s214_s15] sm:$0xff]  ;;  %v703_v5 = vmov 0.0   ;;  %vm704_vm1 = vmmov 0   ;;  %v255_v7 = vlaneseq  ;;  %s539_s7 = sshll.u32 %s758_s22, 7 }
  0x38   : > { %v243_v1 = vcombine.high %v241_v0, %v241_v0  ;;  %v246_v2 = vsel %vm245_vm0, %v241_v0, 0.0  ;;  %544 = vmatprep.subr.mxu0 %v703_v5  ;;  %v252_v6 = vld [vmem:[%s915_s1] sm:$0xf]  ;;  %549 = vmatprep.subr.mxu1 %v703_v5  ;;  %vm261_vm2 = vcmask 31744   ;;  %vm340_vm3 = vcmask 64512   ;;  %s240_s9 = scalar_lea.vmem [#allocation5], %s528_s17  ;;  %s870_s15 = scalar_lea.hbm %s919_s5, %s539_s7 }
  0x39   : > { %545 = vmatpush3.msk.msra.mxu0 %vm245_vm0, %v252_v6  ;;  %546 = vmatprep.mubr.msk.f32.mxu0 %vm704_vm1, %v703_v5  ;;  %v256_v8 = vand.u32 127, %v255_v7  ;;  %v258_v9 = vshrl.u32 %v255_v7, 7  ;;  %v338_v14 = vld [vmem:[%s917_s3] sm:$0xff]  ;;  %v705_v30 = vmov 839922192   ;;  %s451_s10 = sshll.u32 %s240_s9, 4  ;;  %s872_s10 = int_to_ptr.vmem [resolvable:$true] %s451_s10 }
  0x3a   : > { %v247_v3 = vsel %vm245_vm0, %v243_v1, 0.0  ;;  %551 = vmatprep.mubr.msk.f32.mxu1 %vm704_vm1, %v703_v5  ;;  %550 = vmatpush3.msra.mxu1 %v338_v14  ;;  %v253_v15 = vld [vmem:[%s916_s2] sm:$0x1]  ;;  %v427_v31 = vunpack.c.l.s4 %v705_v30  ;;  %s437_s12 = scalar_lea.sflag [#allocation4], %s842_s13  ;;  %s634_s14 = scalar_lea.vmem %s872_s10, 128 }
  0x3b   : > { %v248_v4 = vadd.f32 %v247_v3, %v246_v2  ;;  %v259_v10 = vsub.s32 %v256_v8, %v258_v9  ;;  %v339_v20 = vld [vmem:[%s918_s4] sm:$0x1]  ;;  %v420_v27 = vsub.s32 0, %v258_v9  ;;  %p635_p6 = scmp.ne.s32.totalorder %s872_s10, %s634_s14  ;;  %p928_p11 = scmp.ne.s32.totalorder %s923_s30, 0 }
  0x3c   : > { %v428_v32 = vunpack.c.0.s8 %v427_v31  ;;  %s706_s22 = smov [#allocation5]  }
  0x3d   : > { %249 = vadd.xlane.f32.xlu0 %v248_v4  ;;  %p636_p12 = pnand %p635_p6, %p928_p11  ;;  %s638_s17 = sshll.u32 %s706_s22, 4  ;;  %s639_s17 = int_to_ptr.vmem [resolvable:$false] %s638_s17 }
  0x3e   : > { %v431_v33 = vsub.s32 %v428_v32, %v258_v9  ;;  %s640_s29 = scalar_lea.vmem %s639_s17, 256  ;;  %p641_p7 = scmp.lt.s32.totalorder %s872_s10, %s639_s17 }
  0x3f   : > { %p637_p13 = pneg %p636_p12  ;;  %p642_p10 = scmp.lt.s32.totalorder %s640_s29, %s634_s14 }
  0x41   : > { %p643_p2 = por %p642_p10, %p641_p7 }
  0x43   : > { %p644_p4 = pnand %p643_p2, %p637_p13 }
  0xca   : > { %v250_v11 = vpop.xlane.xlu0 %249 }
  0xcb   : > { %v251_v12 = vmul.f32 0.00390625, %v250_v11 }
  0xcd   : > { %v260_v13 = vrot.slane %v251_v12, %v259_v10 }
  0xcf   : > { %547 = vmatmul.mubr.msk.f32.vlgmr.msra.gmra.mrb[0].mxu0 %vm261_vm2, %v260_v13 }
 0x1a2   : > { %v333_v16 = vpop.f32.mrb[0].mxu0 }
 0x1a3   : > { %v334_v17 = vadd.f32 %v333_v16, %v253_v15  ;;  %v548_v18 = vpop.f32.mrb[1].mxu0 }
 0x1a5   : > { %v337_v19 = vmax.f32 %v334_v17, 0.0 }
 0x1a7   : > { %552 = vmatmul.mubr.msk.f32.vlgmr.msra.gmra.mrb[0].mxu1 %vm340_vm3, %v337_v19 }
 0x27a   : > { %v410_v21 = vpop.f32.mrb[0].mxu1 }
 0x27b   : > { %v411_v22 = vadd.f32 %v410_v21, %v339_v20  ;;  %v553_v23 = vpop.f32.mrb[1].mxu1 }
 0x27d   : > { %v414_v24 = vadd.f32 3.0, %v411_v22 }
 0x27f   : > { %v415_v25 = vmul.f32 0.16666667, %v414_v24 }
 0x281   : > { %v416_v26 = vmax.f32 %v415_v25, 0.0 }
 0x283   : > { %v417_v28 = vmin.f32 %v416_v26, 1.0 }
 0x285   : > { %v421_v29 = vrot.slane %v417_v28, %v420_v27 }
 0x287   : > { %423 = vbcast.lane.b32.xlu0 %v421_v29, 256 }
 0x2f9   : > { %v424_v34 = vpop.permute.xlu0 %423 }
 0x2fa   : > { %v432_v35 = vrot.slane %v424_v34, %v431_v33 }
 0x2fc   : > { %v434_v36 = vmul.f32 %v432_v35, %v241_v0 }
 0x2fe   : > { %435 = vst [vmem:[%s240_s9] sm:$0xff] %v434_v36 }
 0x2ff   : > { %647 = shalt.err (!%p644_p4)
}
 0x300   : > { %s648_s13 = scalar_lea.hbm %s870_s15, 128  ;;  %s652_s26 = scalar_lea.hbm %s919_s5, 256 }
 0x301   : > { %p649_p5 = scmp.ne.s32.totalorder %s870_s15, %s648_s13  ;;  %p653_p0 = scmp.lt.u32.totalorder %s870_s15, %s919_s5 }
 0x302   : > { %p654_p1 = scmp.lt.u32.totalorder %s652_s26, %s648_s13  ;;  %p656_p6 = scmp.lt.u32.totalorder %s648_s13, %s870_s15 }
 0x303   : > { %p650_p8 = pnand %p649_p5, %p928_p11 }
 0x304   : > { %p655_p3 = por %p654_p1, %p653_p0 }
 0x305   : > { %p651_p9 = pneg %p650_p8 }
 0x306   : > { %p657_p12 = por %p656_p6, %p655_p3 }
 0x308   : > { %p658_p13 = pnand %p657_p12, %p651_p9 }
 0x30a   : > { %661 = shalt.err (!%p658_p13)
}
 0x30b   : > { %556 = dma.vmem_to_hbm [thread:$0]  (%p928_p11), %s872_s10, 128, %s870_s15, %s437_s12  }
 0x30c PF: > { %s463_s7 = sand.u32 1, %s688_s18   ;;  %p929_p7 = scmp.ne.s32.totalorder %s924_s6, 0 }
 0x30d   : > { %p930_p10 = scmp.ge.s32.totalorder %s700_s21, 2  ;;  %s464_s9 = scalar_lea.sflag [#allocation4], %s463_s7 }
 0x30f   : > { %p563_p2 = pnand %p930_p10, %p929_p7 }
 0x311   : > { %683 = dma.done.wait (!%p563_p2), %s464_s9, 128  }
 0x312   : > { %685 = vsyncadd (!%p563_p2), %s464_s9, 4294967168  ;;  %p18_p4 = scmp.ge.s32.totalorder %s762_s24, 4   ;;  %s931_s18 = smov %s692_s19 }
 0x313   : > { %s932_s19 = smov %s696_s20  ;;  %s933_s20 = smov %s774_s27 }
 0x314   : > { %s934_s21 = smov %s762_s24  ;;  %20 = sbr.rel (!%p18_p4) target bundleno = 5 (0x5), region = 85 }
 0x31b   :  { %469 = vsyncpa [#allocation3], 1 }
 0x31c   :  { %471 = vsyncpa [#allocation3 + $0x1], 1 }
 0x31d   :  { %472 = vsyncpa [#allocation4], 1 }
 0x31e   :  { %474 = vsyncpa [#allocation4 + $0x1], 1 }

</bundles_post_ra>
